<compile_context>
chip_gen: v6e
topology: v6e:2x2x1
jax: 0.10.0
libtpu: 0.0.40
codegen_flags: <defaults>
</compile_context>

<pallas_src>
import functools

import jax
import jax.numpy as jnp
import numpy as np
from jax import lax
from jax.experimental import pallas as pl
from jax.experimental.pallas import tpu as pltpu


# ----------------------------------------------------------------------------
# Static tiling / padding constants.
# ----------------------------------------------------------------------------
TILE_P = 8                      # pooled rows produced per row tile
TH = 2 * TILE_P                 # conv-output rows per row tile
CHAN_ROWS = 24                  # input rows staged per channel (>= TH+2, mult of 8)

K_REAL = 16 * 54 * 54           # 46656 flattened features after conv2
K_PAD = 366 * 128               # 46848: lane-aligned, splits as 2 x 183 x 128
K_HALF = K_PAD // 2             # one TensorCore's share of the fc1 reduction

H_PAD_IN, W_PAD_IN = 248, 256   # conv1 input padding: uniform row tiles, lane-dense
C1_POOL_H = 120                 # conv1 stored pooled rows (111 real + padding)
C2_POOL_H = 56                  # conv2 stored pooled rows (54 real + padding)

# Extent invariants: real pooled outputs never read wrapped / padded garbage.
assert 2 * 110 + 1 + 2 <= 224 - 1      # conv1 real pooled rows/cols read real input only
assert 2 * 53 + 1 + 2 <= 111 - 1       # conv2 real pooled rows/cols read conv1's real region
assert TH * (C1_POOL_H // TILE_P - 1) + CHAN_ROWS <= H_PAD_IN      # conv1 row loads in-bounds
assert TH * (C2_POOL_H // TILE_P - 1) + CHAN_ROWS <= C1_POOL_H     # conv2 row loads in-bounds


# ----------------------------------------------------------------------------
# pltpu.roll convention probe (tiny kernel, run once, cached).  We only need a
# "left" lane rotation: result[..., c] = v[..., c + k].
# ----------------------------------------------------------------------------
@functools.lru_cache(maxsize=None)
def _roll_is_numpy_convention():
    def kern(x_ref, o_ref):
        o_ref[...] = pltpu.roll(x_ref[...], 1, axis=1)

    x = jnp.arange(8 * 128, dtype=jnp.float32).reshape(8, 128)
    y = np.asarray(
        pl.pallas_call(kern, out_shape=jax.ShapeDtypeStruct((8, 128), jnp.float32))(x))
    xn = np.asarray(x)
    if np.array_equal(y, np.roll(xn, 1, axis=1)):
        return True            # pltpu.roll(v, s)[c] == v[c - s]   (numpy convention)
    if np.array_equal(y, np.roll(xn, -1, axis=1)):
        return False           # pltpu.roll(v, s)[c] == v[c + s]
    raise RuntimeError("unexpected pltpu.roll semantics")


def _shift_lanes_left(v, k, roll_np):
    """result[..., c] = v[..., (c + k) % width]  via an XLU lane rotation."""
    if k == 0:
        return v
    width = v.shape[-1]
    amount = (width - k) if roll_np else k
    return pltpu.roll(v, amount, axis=v.ndim - 1)


# ----------------------------------------------------------------------------
# Conv selector matrices (built once, outside the forward).
#   S_kw[co*TH + r, ci*CHAN_ROWS + r + kh] = w[co, ci, kh, kw]
#   S_0 [co*TH + r, cin*CHAN_ROWS]         = b[co]   (bias via a ones stack row)
# so that  (sum_kw roll_left(S_kw @ stack, kw))[co*TH + r, c]
#        =  sum_{ci,kh,kw} w[co,ci,kh,kw] * x[ci, base+r+kh, c+kw] + b[co].
# ----------------------------------------------------------------------------
def _build_conv_selectors(w, b):
    w = np.asarray(w, np.float32)
    b = np.asarray(b, np.float32)
    cout, cin, kh_n, kw_n = w.shape
    assert (kh_n, kw_n) == (3, 3)
    k_cols = cin * CHAN_ROWS + 8
    sel = np.zeros((3, cout * TH, k_cols), np.float32)
    for kw in range(3):
        for co in range(cout):
            for ic in range(cin):
                for kh in range(3):
                    for r in range(TH):
                        sel[kw, co * TH + r, ic * CHAN_ROWS + r + kh] = w[co, ic, kh, kw]
    for co in range(cout):
        sel[0, co * TH:(co + 1) * TH, cin * CHAN_ROWS] = b[co]
    return jnp.asarray(sel)


# ----------------------------------------------------------------------------
# Fused conv(3x3, stride 1, VALID) + bias + ReLU + maxpool(2,2) kernel.
# Grid is over the batch dimension ("parallel").  Each row tile does:
#   * assemble an im2row stack (CHAN_ROWS aligned rows per input channel),
#   * 3 MXU selector matmuls (one per kw tap, output lane-rolled by kw),
#   * ReLU + batched 2x2 max pool via block-diagonal 0/1 selector matmuls.
# ----------------------------------------------------------------------------
def _conv_relu_pool_kernel(x_ref, sel_ref, dhe_ref, dho_ref, dw_ref, o_ref,
                           stack_ref, *, cin, cout, n_tiles, w_in, roll_np):
    # x_ref     : (1, cin, hin, w_in)                      VMEM
    # sel_ref   : (3, cout*TH, cin*CHAN_ROWS + 8)          VMEM
    # dhe/dho   : (cout*TILE_P, cout*TH)  block-diag row-pair selectors
    # dw_ref    : (w_in, w_out)           even-col selector + lane-tail zeroing
    # o_ref     : (1, cout, n_tiles, TILE_P, w_out)
    # stack_ref : (cin*CHAN_ROWS + 8, w_in) scratch
    f32 = jnp.float32
    ones_row0 = cin * CHAN_ROWS

    # Constant bias rows of the stack: row 0 = ones (bias tap), rows 1..7 = 0.
    stack_ref[pl.ds(ones_row0, 8), :] = (
        lax.broadcasted_iota(jnp.int32, (8, w_in), 0) == 0).astype(f32)

    def tile_body(t, carry):
        base = pl.multiple_of(TH * t, TH)

        # Assemble the per-tile stack (aligned 24-row slab per input channel).
        for ic in range(cin):
            stack_ref[pl.ds(ic * CHAN_ROWS, CHAN_ROWS), :] = (
                x_ref[0, ic, pl.ds(base, CHAN_ROWS), :])
        stack = stack_ref[...]

        # conv 3x3 + bias: one MXU matmul per kw tap; the kw column shift is a
        # lane roll of the matmul output (wrapped lanes only feed pooled
        # columns that dw zeroes / the wrapper discards).
        acc = jnp.dot(sel_ref[0], stack, preferred_element_type=f32)
        acc = acc + _shift_lanes_left(
            jnp.dot(sel_ref[1], stack, preferred_element_type=f32), 1, roll_np)
        acc = acc + _shift_lanes_left(
            jnp.dot(sel_ref[2], stack, preferred_element_type=f32), 2, roll_np)

        a = jnp.maximum(acc, 0.0)                        # bias is already in acc
        # 2x2 max pool (floor mode), batched over all output channels.
        row_max = jnp.maximum(
            jnp.dot(dhe_ref[...], a, preferred_element_type=f32),
            jnp.dot(dho_ref[...], a, preferred_element_type=f32))
        col_max = jnp.maximum(row_max, _shift_lanes_left(row_max, 1, roll_np))
        pooled = jnp.dot(col_max, dw_ref[...], preferred_element_type=f32)

        for oc in range(cout):
            o_ref[0, oc, t, :, :] = pooled[oc * TILE_P:(oc + 1) * TILE_P, :]
        return carry

    lax.fori_loop(0, n_tiles, tile_body, 0)


def conv_relu_pool(x, sel, *, pooled_h_store, pooled_w_store, pooled_w_real):
    """x: (n, cin, hin, w_in) f32 with w_in % 128 == 0.  Returns a
    (n, cout, pooled_h_store, pooled_w_store) array whose rows/cols beyond the
    real pooled extent are zero / finite don't-care padding."""
    n, cin, hin, w_in = x.shape
    kw_taps, m_rows, k_cols = sel.shape
    assert kw_taps == 3 and m_rows % TH == 0
    cout = m_rows // TH
    assert k_cols == cin * CHAN_ROWS + 8
    assert pooled_h_store % TILE_P == 0
    n_tiles = pooled_h_store // TILE_P
    assert w_in % 128 == 0 and pooled_w_store % 128 == 0
    assert hin >= TH * (n_tiles - 1) + CHAN_ROWS        # row loads stay in bounds
    assert w_in >= 2 * pooled_w_real + 2

    # Block-diagonal even/odd conv-row selectors for the 2x2 pool.
    ri = jnp.arange(cout * TILE_P, dtype=jnp.int32)[:, None]
    cj = jnp.arange(cout * TH, dtype=jnp.int32)[None, :]
    same_oc = (cj // TH) == (ri // TILE_P)
    dhe = (same_oc & (cj % TH == 2 * (ri % TILE_P))).astype(jnp.float32)
    dho = (same_oc & (cj % TH == 2 * (ri % TILE_P) + 1)).astype(jnp.float32)
    # Even-column pool selector (+ zero padding of the lane tail).
    col = jnp.arange(w_in, dtype=jnp.int32)[:, None]
    out_col = jnp.arange(pooled_w_store, dtype=jnp.int32)[None, :]
    dw = ((col == 2 * out_col) & (out_col < pooled_w_real)).astype(jnp.float32)

    kernel = functools.partial(
        _conv_relu_pool_kernel, cin=cin, cout=cout, n_tiles=n_tiles, w_in=w_in,
        roll_np=_roll_is_numpy_convention())

    out5 = pl.pallas_call(
        kernel,
        out_shape=jax.ShapeDtypeStruct(
            (n, cout, n_tiles, TILE_P, pooled_w_store), jnp.float32),
        grid=(n,),
        in_specs=[
            pl.BlockSpec((1, cin, hin, w_in), lambda bi: (bi, 0, 0, 0)),
            pl.BlockSpec((3, m_rows, k_cols), lambda bi: (0, 0, 0)),
            pl.BlockSpec((cout * TILE_P, cout * TH), lambda bi: (0, 0)),
            pl.BlockSpec((cout * TILE_P, cout * TH), lambda bi: (0, 0)),
            pl.BlockSpec((w_in, pooled_w_store), lambda bi: (0, 0)),
        ],
        out_specs=pl.BlockSpec((1, cout, n_tiles, TILE_P, pooled_w_store),
                               lambda bi: (bi, 0, 0, 0, 0)),
        scratch_shapes=[pltpu.VMEM((k_cols, w_in), jnp.float32)],
        compiler_params=pltpu.CompilerParams(dimension_semantics=("parallel",)),
    )(x, sel, dhe, dho, dw)
    return out5.reshape(n, cout, pooled_h_store, pooled_w_store)


# ----------------------------------------------------------------------------
# fc1: bf16 weight stream, K reduction split into two halves on a "parallel"
# grid axis (one half per v7x TensorCore; two pipelined steps on v5e/v6e).
# ----------------------------------------------------------------------------
def _fc1_partial_kernel(x_ref, w1_ref, part_ref):
    part_ref[0, :, :] = jnp.dot(x_ref[...], w1_ref[...],
                                preferred_element_type=jnp.float32)


def fc1_partial(x_flat_bf16, w1_bf16):
    n = x_flat_bf16.shape[0]
    assert x_flat_bf16.shape == (n, K_PAD) and w1_bf16.shape == (K_PAD, 128)
    return pl.pallas_call(
        _fc1_partial_kernel,
        out_shape=jax.ShapeDtypeStruct((2, n, 128), jnp.float32),
        grid=(2,),
        in_specs=[
            pl.BlockSpec((n, K_HALF), lambda c: (0, c)),
            pl.BlockSpec((K_HALF, 128), lambda c: (c, 0)),
        ],
        out_specs=pl.BlockSpec((1, n, 128), lambda c: (c, 0, 0)),
        compiler_params=pltpu.CompilerParams(
            dimension_semantics=("parallel",),
            vmem_limit_bytes=32 * 1024 * 1024),
    )(x_flat_bf16, w1_bf16)


# ----------------------------------------------------------------------------
# MLP epilogue: combine fc1 partials + bias, relu, fc2, relu, fc3, log_softmax.
# ----------------------------------------------------------------------------
def _mlp_epilogue_kernel(part_ref, b1_ref, w2_ref, b2_ref, w3_ref, b3_ref, out_ref):
    f32 = jnp.float32
    h1 = jnp.maximum(part_ref[0] + part_ref[1] + b1_ref[...], 0.0)
    h2 = jnp.maximum(
        jnp.dot(h1, w2_ref[...], preferred_element_type=f32) + b2_ref[...], 0.0)
    logits = jnp.dot(h2, w3_ref[...], preferred_element_type=f32) + b3_ref[...]
    m = jnp.max(logits, axis=1, keepdims=True)
    s = logits - m
    out_ref[...] = s - jnp.log(jnp.sum(jnp.exp(s), axis=1, keepdims=True))


def mlp_epilogue(partials, b1, w2, b2, w3, b3):
    n = partials.shape[1]
    assert partials.shape == (2, n, 128)
    return pl.pallas_call(
        _mlp_epilogue_kernel,
        out_shape=jax.ShapeDtypeStruct((n, 2), jnp.float32),
        grid=(1,),
        in_specs=[
            pl.BlockSpec((2, n, 128), lambda i: (0, 0, 0)),
            pl.BlockSpec((1, 128), lambda i: (0, 0)),
            pl.BlockSpec((128, 84), lambda i: (0, 0)),
            pl.BlockSpec((1, 84), lambda i: (0, 0)),
            pl.BlockSpec((84, 2), lambda i: (0, 0)),
            pl.BlockSpec((1, 2), lambda i: (0, 0)),
        ],
        out_specs=pl.BlockSpec((n, 2), lambda i: (0, 0)),
        compiler_params=pltpu.CompilerParams(dimension_semantics=("arbitrary",)),
    )(partials, b1.reshape(1, 128), w2, b2.reshape(1, 84), w3, b3.reshape(1, 2))


# ----------------------------------------------------------------------------
# Parameter prep + full network forward.
# ----------------------------------------------------------------------------
def prepare_params(params):
    """One-time prep (outside the forward): build conv selector matrices, pad
    fc1 to 128 output lanes / K_PAD contraction rows and cast its mem-bound
    weight to bf16, pad fc2's input dim to 128."""
    c1w, c1b, c2w, c2b, f1w, f1b, f2w, f2b, f3w, f3b = params
    sel1 = _build_conv_selectors(c1w, c1b)
    sel2 = _build_conv_selectors(c2w, c2b)
    f1w_p = jnp.pad(f1w, ((0, K_PAD - K_REAL), (0, 128 - 120))).astype(jnp.bfloat16)
    f1b_p = jnp.pad(f1b, ((0, 128 - 120),))
    f2w_p = jnp.pad(f2w, ((0, 128 - 120), (0, 0)))
    return (sel1, sel2, f1w_p, f1b_p, f2w_p, f2b, f3w, f3b)


def network_forward(x, prepped):
    sel1, sel2, f1w_p, f1b_p, f2w_p, f2b, f3w, f3b = prepped
    n = x.shape[0]
    assert x.shape[1:] == (3, 224, 224)
    # Zero-pad H/W so row tiles are uniform and rows are lane-dense; the padded
    # region only feeds pooled rows/cols that are discarded below.
    xp = jnp.pad(x, ((0, 0), (0, 0), (0, H_PAD_IN - 224), (0, W_PAD_IN - 224)))
    y1 = conv_relu_pool(xp, sel1, pooled_h_store=C1_POOL_H,
                        pooled_w_store=128, pooled_w_real=111)
    y2 = conv_relu_pool(y1, sel2, pooled_h_store=C2_POOL_H,
                        pooled_w_store=128, pooled_w_real=54)
    # Drop the stored-but-unused pooled rows/cols; flatten like torch's .view.
    flat = y2[:, :, :54, :54].reshape(n, K_REAL)
    flat = jnp.pad(flat, ((0, 0), (0, K_PAD - K_REAL))).astype(jnp.bfloat16)
    partials = fc1_partial(flat, f1w_p)
    return mlp_epilogue(partials, f1b_p, f2w_p, f2b, f3w, f3b)


# ----------------------------------------------------------------------------
# Pure-JAX reference for validation (uses original unpadded params).
# quantize_fc1=True mirrors the kernel's bf16 streaming of fc1 inputs/weights.
# ----------------------------------------------------------------------------
def reference_forward(x, params, *, quantize_fc1=False):
    (c1w, c1b, c2w, c2b, f1w, f1b, f2w, f2b, f3w, f3b) = params
    dn = ("NCHW", "OIHW", "NCHW")

    def pool(v):
        return lax.reduce_window(v, -jnp.inf, lax.max,
                                 (1, 1, 2, 2), (1, 1, 2, 2), "VALID")

    y = lax.conv_general_dilated(x, c1w, (1, 1), "VALID", dimension_numbers=dn)
    y = pool(jax.nn.relu(y + c1b[None, :, None, None]))
    y = lax.conv_general_dilated(y, c2w, (1, 1), "VALID", dimension_numbers=dn)
    y = pool(jax.nn.relu(y + c2b[None, :, None, None]))
    flat = y.reshape(y.shape[0], -1)
    if quantize_fc1:
        flat = flat.astype(jnp.bfloat16).astype(jnp.float32)
        f1w = f1w.astype(jnp.bfloat16).astype(jnp.float32)
    y = jax.nn.relu(flat @ f1w + f1b)
    y = jax.nn.relu(y @ f2w + f2b)
    y = y @ f3w + f3b
    return jax.nn.log_softmax(y, axis=1)


def init_params(key):
    ks = jax.random.split(key, 10)

    def u(k, shape, fan_in):
        bound = 1.0 / np.sqrt(fan_in)
        return jax.random.uniform(k, shape, jnp.float32, -bound, bound)

    # FC weights are stored as (in, out) — equivalent affine maps to nn.Linear.
    return (
        u(ks[0], (6, 3, 3, 3), 3 * 9),   u(ks[1], (6,), 3 * 9),
        u(ks[2], (16, 6, 3, 3), 6 * 9),  u(ks[3], (16,), 6 * 9),
        u(ks[4], (54 * 54 * 16, 120), 54 * 54 * 16), u(ks[5], (120,), 54 * 54 * 16),
        u(ks[6], (120, 84), 120),        u(ks[7], (84,), 120),
        u(ks[8], (84, 2), 84),           u(ks[9], (2,), 84),
    )


if __name__ == "__main__":
    root = jax.random.PRNGKey(0)
    pkey, xkey = jax.random.split(root)
    params = init_params(pkey)
    prepped = prepare_params(params)
    # Spatial size is dictated by fc1 (54*54*16): input must be 3x224x224.
    x = jax.random.normal(xkey, (2, 3, 224, 224), jnp.float32)

    _roll_is_numpy_convention()          # warm the roll-convention probe

    fwd = jax.jit(network_forward)
    out = jax.block_until_ready(fwd(x, prepped))

    ref_q = jax.block_until_ready(reference_forward(x, params, quantize_fc1=True))
    ref_f = jax.block_until_ready(reference_forward(x, params, quantize_fc1=False))

    assert out.shape == (2, 2), out.shape
    assert np.isfinite(np.asarray(out)).all()
    err_q = float(jnp.max(jnp.abs(out - ref_q)))   # kernel vs bf16-fc1 reference
    err_f = float(jnp.max(jnp.abs(out - ref_f)))   # kernel vs full-f32 reference
    assert err_q < 2e-3, f"mismatch vs bf16-fc1 reference: {err_q}"
    assert err_f < 2e-2, f"mismatch vs f32 reference (bf16 quantization budget): {err_f}"

    print("KERNEL_OK")
</pallas_src>

<mosaic_0001>
module attributes {stable_mosaic.version = 11 : i64} {
  func.func @kern(%arg0: memref<8x128xf32, #tpu.memory_space<vmem>>, %arg1: memref<8x128xf32, #tpu.memory_space<vmem>>) attributes {dimension_semantics = [], scalar_prefetch = 0 : i64, scratch_operands = 0 : i64, tpu.core_type = #tpu.core_type<tc>} {
    %c0 = arith.constant 0 : index
    %c0_0 = arith.constant 0 : index
    %0 = vector.load %arg0[%c0, %c0_0] : memref<8x128xf32, #tpu.memory_space<vmem>>, vector<8x128xf32>
    %c1_i32 = arith.constant 1 : i32
    %1 = tpu.dynamic_rotate %0 by %c1_i32 dim 1 : vector<8x128xf32>, i32 -> vector<8x128xf32>
    %c0_1 = arith.constant 0 : index
    %c0_2 = arith.constant 0 : index
    %2 = vector.load %arg1[%c0_1, %c0_2] : memref<8x128xf32, #tpu.memory_space<vmem>>, vector<8x128xf32>
    tpu.vector_store %arg1[%c0_1, %c0_2], %1 {strides = array<i32>} : memref<8x128xf32, #tpu.memory_space<vmem>>, vector<8x128xf32>,
    return
  }
}

</mosaic_0001>

<bundles_post_ra>
// kernel: tpu_custom_call.1
= control target key start
LH: loop header
LB: loop body
LE: loop exit
PB: predicated region body
PF: predicated region fallthrough
CT: control target
= control target key end

     0   :  { %6 = vsyncpa [#allocation3], 0  ;;  %s106_s0 = inlined_call_operand.hbm [shape: f32[8,128], index: 0, kind: input, shape index: {}]   ;;  %s107_s1 = inlined_call_operand.hbm [shape: f32[8,128], index: 1, kind: output, shape index: {}]  }
   0x1   :  { %7 = vsyncpa [#allocation4], 0  ;;  %s87_s6 = smov [#allocation2]  }
   0x2   :  { %s14_s7 = sshll.u32 %s87_s6, 4  ;;  %s15_s7 = int_to_ptr.vmem [resolvable:$true] %s14_s7 }
   0x3   :  { %s51_s8 = scalar_lea.vmem %s15_s7, 128  ;;  %p56_p1 = scmp.lt.s32.totalorder %s15_s7, %s15_s7 }
   0x4   :  { %p52_p0 = scmp.ne.s32.totalorder %s15_s7, %s51_s8  ;;  %p57_p2 = scmp.lt.s32.totalorder %s51_s8, %s51_s8 }
   0x6   :  { %p58_p3 = por %p57_p2, %p56_p1 }
   0x8   :  { %p59_p4 = pnand %p58_p3, %p52_p0 }
   0xa   :  { %62 = shalt.err (!%p59_p4)
}
   0xb   :  { %17 = dma.hbm_to_vmem [thread:$0]  %s106_s0, 128, %s15_s7, [#allocation3]  }
   0xc   :  { %83 = dma.done.wait [#allocation3], 128  }
   0xd   :  { %84 = vsyncadd [#allocation3], 4294967168  ;;  %v21_v0 = vld [vmem:[#allocation2] sm:$0xff]  ;;  %s88_s11 = smov 1   ;;  %s89_s12 = smov [#allocation5]  }
   0xe   :  { %22 = vrot.lane.b32.xlu0 %v21_v0, %s88_s11  ;;  %s31_s13 = sshll.u32 %s89_s12, 4  ;;  %s32_s13 = int_to_ptr.vmem [resolvable:$true] %s31_s13 }
   0xf   :  { %s63_s14 = scalar_lea.vmem %s32_s13, 128  ;;  %p68_p6 = scmp.lt.s32.totalorder %s32_s13, %s32_s13 }
  0x10   :  { %p64_p5 = scmp.ne.s32.totalorder %s32_s13, %s63_s14  ;;  %p69_p7 = scmp.lt.s32.totalorder %s63_s14, %s63_s14 }
  0x12   :  { %p70_p8 = por %p69_p7, %p68_p6 }
  0x14   :  { %p71_p9 = pnand %p70_p8, %p64_p5 }
  0x80   :  { %v23_v1 = vpop.permute.xlu0 %22 }
  0x81   :  { %24 = vst [vmem:[#allocation5] sm:$0xff] %v23_v1 }
  0x82   :  { %74 = shalt.err (!%p71_p9)
}
  0x83   :  { %34 = dma.vmem_to_hbm [thread:$0]  %s32_s13, 128, %s107_s1, [#allocation4]  }
  0x84   :  { %85 = dma.done.wait [#allocation4], 128  }
  0x85   :  { %86 = vsyncadd [#allocation4], 4294967168 }
  0x86   :  { %38 = vsyncpa [#allocation3], 1 }
  0x87   :  { %39 = vsyncpa [#allocation4], 1 }

</bundles_post_ra>
